<compile_context>
chip_gen: v7x
topology: tpu7x:2x2x1
jax: 0.10.0
libtpu: 0.0.40
codegen_flags: <defaults>
</compile_context>

<pallas_src>
import jax
import jax.numpy as jnp
from jax.experimental import pallas as pl
from jax.experimental.pallas import tpu as pltpu

N_NEURONS = 50      # hidden width of the PyTorch module
HP = 128            # lane-padded hidden width (zero padding -> identical math)
OP = 128            # lane-padded output width (only column 0 is real)


def _mlp_kernel(x_ref, w1_ref, wmid_ref, w5_ref, b_ref, o_ref):
    x = x_ref[...].astype(jnp.float32)            # (TB, IN)
    tb, in_size = x.shape

    # ---- layer 1: fc1 + ReLU ------------------------------------------------
    b1 = b_ref[0:1, :]                            # (1, HP)
    if in_size <= 8:
        # Tiny contraction: a padded K=2 MXU pass would run at <2% utilization.
        # Do it as VPU broadcast multiply-adds and keep the MXU slot free.
        acc = b1 + x[:, 0:1] * w1_ref[0:1, :]
        for k in range(1, in_size):
            acc = acc + x[:, k:k + 1] * w1_ref[k:k + 1, :]
    else:
        acc = jnp.dot(x, w1_ref[...], preferred_element_type=jnp.float32) + b1
    h = jnp.maximum(acc, 0.0)

    # ---- layers 2..4: fc2/fc3/fc4 + ReLU (pre-transposed weights, no .T) ----
    for l in range(3):
        z = jnp.dot(h, wmid_ref[l], preferred_element_type=jnp.float32)
        h = jnp.maximum(z + b_ref[l + 1:l + 2, :], 0.0)

    # ---- layer 5: fc5 + sigmoid, kept lane-wide for an unmasked store -------
    z = jnp.dot(h, w5_ref[...], preferred_element_type=jnp.float32) + b_ref[4:5, :]
    o_ref[...] = jax.nn.sigmoid(z).astype(o_ref.dtype)


def mlp_moons_forward(x, packed_params, *, tb=None):
    """x: [B, input_size] float32. packed_params: output of pack_params()."""
    w1t, wmid, w5t, biases = packed_params
    B, in_size = x.shape
    if tb is None:
        # batch tile: multiple of 8 sublanes, capped so 2x(TB,128) f32 buffers
        # stay tiny even under v7x's smaller scoped-VMEM budget.
        tb = max(8, min(512, ((B + 7) // 8) * 8))
    grid = (pl.cdiv(B, tb),)

    out = pl.pallas_call(
        _mlp_kernel,
        out_shape=jax.ShapeDtypeStruct((B, OP), jnp.float32),
        grid=grid,
        in_specs=[
            pl.BlockSpec((tb, in_size), lambda i: (i, 0)),   # activations: tiled
            pl.BlockSpec((in_size, HP), lambda i: (0, 0)),   # w1t: resident
            pl.BlockSpec((3, HP, HP), lambda i: (0, 0, 0)),  # fc2..fc4: resident
            pl.BlockSpec((HP, OP), lambda i: (0, 0)),        # w5t: resident
            pl.BlockSpec((5, HP), lambda i: (0, 0)),         # biases: resident
        ],
        out_specs=pl.BlockSpec((tb, OP), lambda i: (i, 0)),
        compiler_params=pltpu.CompilerParams(
            dimension_semantics=("parallel",)),
    )(x, w1t, wmid, w5t, biases)

    # only lane 0 of the padded output carries the real logit
    return out[:, :1]


def init_params(key, input_size):
    """Deterministic init matching nn.Linear shapes (W: [out, in], b: [out])."""
    sizes = [(input_size, N_NEURONS),
             (N_NEURONS, N_NEURONS),
             (N_NEURONS, N_NEURONS),
             (N_NEURONS, N_NEURONS),
             (N_NEURONS, 1)]
    params = []
    for (fan_in, fan_out) in sizes:
        key, kw, kb = jax.random.split(key, 3)
        bound = 1.0 / jnp.sqrt(jnp.float32(fan_in))
        w = jax.random.uniform(kw, (fan_out, fan_in), jnp.float32, -bound, bound)
        b = jax.random.uniform(kb, (fan_out,), jnp.float32, -bound, bound)
        params.append((w, b))
    return params


def pack_params(params):
    """Pre-transpose to [in, out], zero-pad to lane width 128, pack into 4 arrays."""
    (w1, b1), (w2, b2), (w3, b3), (w4, b4), (w5, b5) = params
    in_size = w1.shape[1]

    w1t = jnp.zeros((in_size, HP), jnp.float32).at[:, :N_NEURONS].set(w1.T)

    wmid = jnp.zeros((3, HP, HP), jnp.float32)
    for i, w in enumerate((w2, w3, w4)):
        wmid = wmid.at[i, :N_NEURONS, :N_NEURONS].set(w.T)

    w5t = jnp.zeros((HP, OP), jnp.float32).at[:N_NEURONS, :1].set(w5.T)

    biases = jnp.zeros((5, HP), jnp.float32)
    for i, b in enumerate((b1, b2, b3, b4)):
        biases = biases.at[i, :N_NEURONS].set(b.reshape(-1))
    biases = biases.at[4, :1].set(b5.reshape(-1))

    return w1t, wmid, w5t, biases


def reference_forward(x, params):
    h = x
    for i, (w, b) in enumerate(params):
        h = jnp.matmul(h, w.T, precision=jax.lax.Precision.HIGHEST) + b
        if i < len(params) - 1:
            h = jnp.maximum(h, 0.0)
    return jax.nn.sigmoid(h)


if __name__ == "__main__":
    key = jax.random.PRNGKey(0)
    input_size = 2   # moons dataset has 2 features
    batch = 8

    kx, kp = jax.random.split(key)
    x = jax.random.normal(kx, (batch, input_size), jnp.float32)
    params = init_params(kp, input_size)
    packed = pack_params(params)

    out = mlp_moons_forward(x, packed)
    out = jax.block_until_ready(out)

    ref = reference_forward(x, params)
    assert out.shape == (batch, 1), out.shape
    assert jnp.allclose(out, ref, atol=1e-5, rtol=1e-5), (out, ref)

    print("KERNEL_OK")
</pallas_src>

<mosaic_0001>
module attributes {stable_mosaic.version = 11 : i64} {
  func.func @_mlp_kernel(%arg0: i32, %arg1: memref<8x2xf32, #tpu.memory_space<vmem>>, %arg2: memref<2x128xf32, #tpu.memory_space<vmem>>, %arg3: memref<3x128x128xf32, #tpu.memory_space<vmem>>, %arg4: memref<128x128xf32, #tpu.memory_space<vmem>>, %arg5: memref<5x128xf32, #tpu.memory_space<vmem>>, %arg6: memref<8x128xf32, #tpu.memory_space<vmem>>) attributes {dimension_semantics = [#tpu.dimension_semantics<parallel>], iteration_bounds = array<i64: 1>, scalar_prefetch = 0 : i64, scratch_operands = 0 : i64, tpu.core_type = #tpu.core_type<tc>, window_params = [{transform_indices = @transform_0, window_bounds = array<i64: 8, 2>}, {pipeline_mode = #tpu.pipeline_mode<synchronous>, transform_indices = @transform_1, window_bounds = array<i64: 2, 128>}, {pipeline_mode = #tpu.pipeline_mode<synchronous>, transform_indices = @transform_2, window_bounds = array<i64: 3, 128, 128>}, {pipeline_mode = #tpu.pipeline_mode<synchronous>, transform_indices = @transform_3, window_bounds = array<i64: 128, 128>}, {pipeline_mode = #tpu.pipeline_mode<synchronous>, transform_indices = @transform_4, window_bounds = array<i64: 5, 128>}, {transform_indices = @transform_5, window_bounds = array<i64: 8, 128>}]} {
    %c0 = arith.constant 0 : index
    %c0_0 = arith.constant 0 : index
    %0 = vector.load %arg1[%c0, %c0_0] : memref<8x2xf32, #tpu.memory_space<vmem>>, vector<8x2xf32>
    %c0_1 = arith.constant 0 : index
    %c0_2 = arith.constant 0 : index
    %1 = vector.load %arg5[%c0_1, %c0_2] : memref<5x128xf32, #tpu.memory_space<vmem>>, vector<1x128xf32>
    %2 = vector.extract_strided_slice %0 {offsets = [0, 0], sizes = [8, 1], strides = [1, 1]} : vector<8x2xf32> to vector<8x1xf32>
    %c0_3 = arith.constant 0 : index
    %c0_4 = arith.constant 0 : index
    %3 = vector.load %arg2[%c0_3, %c0_4] : memref<2x128xf32, #tpu.memory_space<vmem>>, vector<1x128xf32>
    %4 = vector.broadcast %2 : vector<8x1xf32> to vector<8x128xf32>
    %5 = vector.broadcast %3 : vector<1x128xf32> to vector<8x128xf32>
    %6 = arith.mulf %4, %5 : vector<8x128xf32>
    %7 = vector.broadcast %1 : vector<1x128xf32> to vector<8x128xf32>
    %8 = arith.addf %7, %6 : vector<8x128xf32>
    %9 = vector.extract_strided_slice %0 {offsets = [0, 1], sizes = [8, 1], strides = [1, 1]} : vector<8x2xf32> to vector<8x1xf32>
    %c1 = arith.constant 1 : index
    %c0_5 = arith.constant 0 : index
    %10 = vector.load %arg2[%c1, %c0_5] : memref<2x128xf32, #tpu.memory_space<vmem>>, vector<1x128xf32>
    %11 = vector.broadcast %9 : vector<8x1xf32> to vector<8x128xf32>
    %12 = vector.broadcast %10 : vector<1x128xf32> to vector<8x128xf32>
    %13 = arith.mulf %11, %12 : vector<8x128xf32>
    %14 = arith.addf %8, %13 : vector<8x128xf32>
    %cst = arith.constant 0.000000e+00 : f32
    %15 = vector.broadcast %cst : f32 to vector<8x128xf32>
    %16 = arith.maximumf %14, %15 : vector<8x128xf32>
    %c0_6 = arith.constant 0 : index
    %c0_7 = arith.constant 0 : index
    %c0_8 = arith.constant 0 : index
    %17 = vector.load %arg3[%c0_6, %c0_7, %c0_8] : memref<3x128x128xf32, #tpu.memory_space<vmem>>, vector<1x128x128xf32>
    %18 = vector.shape_cast %17 : vector<1x128x128xf32> to vector<128x128xf32>
    %cst_9 = arith.constant dense<0.000000e+00> : vector<8x128xf32>
    %19 = tpu.matmul %16, %18, %cst_9 {dimension_numbers = #tpu.dot_dimension_numbers<[1], [0], [0], [1], [0, 0, 1, 1], [], []>} : vector<8x128xf32>, vector<128x128xf32>, vector<8x128xf32> -> vector<8x128xf32>
    %c1_10 = arith.constant 1 : index
    %c0_11 = arith.constant 0 : index
    %20 = vector.load %arg5[%c1_10, %c0_11] : memref<5x128xf32, #tpu.memory_space<vmem>>, vector<1x128xf32>
    %21 = vector.broadcast %20 : vector<1x128xf32> to vector<8x128xf32>
    %22 = arith.addf %19, %21 : vector<8x128xf32>
    %cst_12 = arith.constant 0.000000e+00 : f32
    %23 = vector.broadcast %cst_12 : f32 to vector<8x128xf32>
    %24 = arith.maximumf %22, %23 : vector<8x128xf32>
    %c1_13 = arith.constant 1 : index
    %c0_14 = arith.constant 0 : index
    %c0_15 = arith.constant 0 : index
    %25 = vector.load %arg3[%c1_13, %c0_14, %c0_15] : memref<3x128x128xf32, #tpu.memory_space<vmem>>, vector<1x128x128xf32>
    %26 = vector.shape_cast %25 : vector<1x128x128xf32> to vector<128x128xf32>
    %cst_16 = arith.constant dense<0.000000e+00> : vector<8x128xf32>
    %27 = tpu.matmul %24, %26, %cst_16 {dimension_numbers = #tpu.dot_dimension_numbers<[1], [0], [0], [1], [0, 0, 1, 1], [], []>} : vector<8x128xf32>, vector<128x128xf32>, vector<8x128xf32> -> vector<8x128xf32>
    %c2 = arith.constant 2 : index
    %c0_17 = arith.constant 0 : index
    %28 = vector.load %arg5[%c2, %c0_17] : memref<5x128xf32, #tpu.memory_space<vmem>>, vector<1x128xf32>
    %29 = vector.broadcast %28 : vector<1x128xf32> to vector<8x128xf32>
    %30 = arith.addf %27, %29 : vector<8x128xf32>
    %cst_18 = arith.constant 0.000000e+00 : f32
    %31 = vector.broadcast %cst_18 : f32 to vector<8x128xf32>
    %32 = arith.maximumf %30, %31 : vector<8x128xf32>
    %c2_19 = arith.constant 2 : index
    %c0_20 = arith.constant 0 : index
    %c0_21 = arith.constant 0 : index
    %33 = vector.load %arg3[%c2_19, %c0_20, %c0_21] : memref<3x128x128xf32, #tpu.memory_space<vmem>>, vector<1x128x128xf32>
    %34 = vector.shape_cast %33 : vector<1x128x128xf32> to vector<128x128xf32>
    %cst_22 = arith.constant dense<0.000000e+00> : vector<8x128xf32>
    %35 = tpu.matmul %32, %34, %cst_22 {dimension_numbers = #tpu.dot_dimension_numbers<[1], [0], [0], [1], [0, 0, 1, 1], [], []>} : vector<8x128xf32>, vector<128x128xf32>, vector<8x128xf32> -> vector<8x128xf32>
    %c3 = arith.constant 3 : index
    %c0_23 = arith.constant 0 : index
    %36 = vector.load %arg5[%c3, %c0_23] : memref<5x128xf32, #tpu.memory_space<vmem>>, vector<1x128xf32>
    %37 = vector.broadcast %36 : vector<1x128xf32> to vector<8x128xf32>
    %38 = arith.addf %35, %37 : vector<8x128xf32>
    %cst_24 = arith.constant 0.000000e+00 : f32
    %39 = vector.broadcast %cst_24 : f32 to vector<8x128xf32>
    %40 = arith.maximumf %38, %39 : vector<8x128xf32>
    %c0_25 = arith.constant 0 : index
    %c0_26 = arith.constant 0 : index
    %41 = vector.load %arg4[%c0_25, %c0_26] : memref<128x128xf32, #tpu.memory_space<vmem>>, vector<128x128xf32>
    %cst_27 = arith.constant dense<0.000000e+00> : vector<8x128xf32>
    %42 = tpu.matmul %40, %41, %cst_27 {dimension_numbers = #tpu.dot_dimension_numbers<[1], [0], [0], [1], [0, 0, 1, 1], [], []>} : vector<8x128xf32>, vector<128x128xf32>, vector<8x128xf32> -> vector<8x128xf32>
    %c4 = arith.constant 4 : index
    %c0_28 = arith.constant 0 : index
    %43 = vector.load %arg5[%c4, %c0_28] : memref<5x128xf32, #tpu.memory_space<vmem>>, vector<1x128xf32>
    %44 = vector.broadcast %43 : vector<1x128xf32> to vector<8x128xf32>
    %45 = arith.addf %42, %44 : vector<8x128xf32>
    %46 = arith.negf %45 : vector<8x128xf32>
    %47 = math.exp %46 : vector<8x128xf32>
    %cst_29 = arith.constant 1.000000e+00 : f32
    %48 = vector.broadcast %cst_29 : f32 to vector<8x128xf32>
    %49 = arith.addf %48, %47 : vector<8x128xf32>
    %50 = arith.divf %48, %49 : vector<8x128xf32>
    %c0_30 = arith.constant 0 : index
    %c0_31 = arith.constant 0 : index
    %51 = vector.load %arg6[%c0_30, %c0_31] : memref<8x128xf32, #tpu.memory_space<vmem>>, vector<8x128xf32>
    tpu.vector_store %arg6[%c0_30, %c0_31], %50 {strides = array<i32>} : memref<8x128xf32, #tpu.memory_space<vmem>>, vector<8x128xf32>,
    return
  }
  func.func @transform_0(%arg0: i32) -> (i32, i32) {
    %c0_i32 = arith.constant 0 : i32
    %c0_i32_0 = arith.constant 0 : i32
    return %arg0, %c0_i32 : i32, i32
  }
  func.func @transform_1(%arg0: i32) -> (i32, i32) {
    %c0_i32 = arith.constant 0 : i32
    %c0_i32_0 = arith.constant 0 : i32
    %c0_i32_1 = arith.constant 0 : i32
    return %c0_i32, %c0_i32_0 : i32, i32
  }
  func.func @transform_2(%arg0: i32) -> (i32, i32, i32) {
    %c0_i32 = arith.constant 0 : i32
    %c0_i32_0 = arith.constant 0 : i32
    %c0_i32_1 = arith.constant 0 : i32
    %c0_i32_2 = arith.constant 0 : i32
    return %c0_i32, %c0_i32_0, %c0_i32_1 : i32, i32, i32
  }
  func.func @transform_3(%arg0: i32) -> (i32, i32) {
    %c0_i32 = arith.constant 0 : i32
    %c0_i32_0 = arith.constant 0 : i32
    %c0_i32_1 = arith.constant 0 : i32
    return %c0_i32, %c0_i32_0 : i32, i32
  }
  func.func @transform_4(%arg0: i32) -> (i32, i32) {
    %c0_i32 = arith.constant 0 : i32
    %c0_i32_0 = arith.constant 0 : i32
    %c0_i32_1 = arith.constant 0 : i32
    return %c0_i32, %c0_i32_0 : i32, i32
  }
  func.func @transform_5(%arg0: i32) -> (i32, i32) {
    %c0_i32 = arith.constant 0 : i32
    %c0_i32_0 = arith.constant 0 : i32
    return %arg0, %c0_i32 : i32, i32
  }
}

</mosaic_0001>

<bundles_post_ra>
// kernel: tpu_custom_call.1
= control target key start
LH: loop header
LB: loop body
LE: loop exit
PB: predicated region body
PF: predicated region fallthrough
CT: control target
= control target key end

     0   :  { %10 = vsyncpa [#allocation3], 0  ;;  %s1011_s0 = inlined_call_operand.vmem [shape: f32[8,2], index: 0, kind: input, shape index: {}]   ;;  %s1012_s1 = inlined_call_operand.vmem [shape: f32[2,128], index: 1, kind: input, shape index: {}]   ;;  %s1013_s2 = inlined_call_operand.hbm [shape: f32[3,128,128], index: 2, kind: input, shape index: {}]   ;;  %s1014_s3 = inlined_call_operand.hbm [shape: f32[128,128], index: 3, kind: input, shape index: {}]   ;;  %s1015_s4 = inlined_call_operand.vmem [shape: f32[5,128], index: 4, kind: input, shape index: {}]   ;;  %s1016_s5 = inlined_call_operand.hbm [shape: f32[8,128], index: 5, kind: output, shape index: {}]  }
   0x1   :  { %11 = vsyncpa [#allocation6], 0 }
   0x2   :  { %12 = vsyncpa [#allocation4], 0  ;;  %s871_s18 = smov [#allocation2]   ;;  %s799_s22 = scalar_lea.hbm %s1013_s2, 6144 }
   0x3   :  { %s22_s19 = sshll.u32 %s871_s18, 4  ;;  %p800_p0 = scmp.ne.s32.totalorder %s1013_s2, %s799_s22  ;;  %s23_s19 = int_to_ptr.vmem [resolvable:$true] %s22_s19 }
   0x4   :  { %p803_p1 = scmp.lt.u32.totalorder %s799_s22, %s1013_s2 }
   0x6   :  { %p805_p2 = pnand %p803_p1, %p800_p0 }
   0x8   :  { %808 = shalt.err (!%p805_p2)
}
   0x9   :  { %s809_s27 = scalar_lea.vmem %s23_s19, 6144  ;;  %p814_p4 = scmp.lt.s32.totalorder %s23_s19, %s23_s19 }
   0xa   :  { %p810_p3 = scmp.ne.s32.totalorder %s23_s19, %s809_s27  ;;  %p815_p5 = scmp.lt.s32.totalorder %s809_s27, %s809_s27 }
   0xc   :  { %p816_p6 = por %p815_p5, %p814_p4 }
   0xe   :  { %p817_p7 = pnand %p816_p6, %p810_p3 }
  0x10   :  { %820 = shalt.err (!%p817_p7)
}
  0x11   :  { %s872_s28 = smov 128   ;;  %s873_s29 = smov 8  }
  0x12   :  { %28 = dma.hbm_to_vmem [thread:$0]  %s1013_s2, 6144, %s23_s19, [#allocation3], %s872_s28, %s872_s28, %s873_s29  }
  0x13   :  { %s874_s7 = smov [#allocation5]   ;;  %s821_s11 = scalar_lea.hbm %s1014_s3, 2048 }
  0x14   :  { %s34_s8 = sshll.u32 %s874_s7, 4  ;;  %p822_p8 = scmp.ne.s32.totalorder %s1014_s3, %s821_s11  ;;  %s35_s8 = int_to_ptr.vmem [resolvable:$true] %s34_s8 }
  0x15   :  { %p825_p9 = scmp.lt.u32.totalorder %s821_s11, %s1014_s3 }
  0x17   :  { %p827_p10 = pnand %p825_p9, %p822_p8 }
  0x19   :  { %830 = shalt.err (!%p827_p10)
}
  0x1a   :  { %s831_s16 = scalar_lea.vmem %s35_s8, 2048  ;;  %p836_p12 = scmp.lt.s32.totalorder %s35_s8, %s35_s8 }
  0x1b   :  { %p832_p11 = scmp.ne.s32.totalorder %s35_s8, %s831_s16  ;;  %p837_p13 = scmp.lt.s32.totalorder %s831_s16, %s831_s16 }
  0x1d   :  { %p838_p0 = por %p837_p13, %p836_p12 }
  0x1f   :  { %p839_p1 = pnand %p838_p0, %p832_p11 }
  0x21   :  { %842 = shalt.err (!%p839_p1)
}
  0x22   :  { %40 = dma.hbm_to_vmem [thread:$0]  %s1014_s3, 2048, %s35_s8, [#allocation6], %s872_s28, %s872_s28, %s873_s29  }
  0x23   :  { %865 = dma.done.wait [#allocation3], 6144  }
  0x24   :  { %866 = vsyncadd [#allocation3], 4294961152 }
  0x25   :  { %867 = dma.done.wait [#allocation6], 2048  }
  0x26   :  { %868 = vsyncadd [#allocation6], 4294965248  ;;  %v875_v0 = vmov 0   ;;  %v876_v1 = vmov 0.0|0.0   ;;  %v49_v2 = vld [vmem:[%s1011_s0] sm:$0xff]  ;;  %v79_v3 = vld [vmem:[#allocation2] sm:$0xff] }
  0x27   :  { %793 = vset.pattern.permute.xlu0 %v875_v0  ;;  %687 = vmatprep.subr.bf16.mxu0 %v876_v1  ;;  %v80_v4 = vld [vmem:[#allocation2 + $0x8] sm:$0xff]  ;;  %v81_v6 = vld [vmem:[#allocation2 + $0x10] sm:$0xff]  ;;  %v82_v7 = vld [vmem:[#allocation2 + $0x18] sm:$0xff]  ;;  %v877_v11 = vmov 1   ;;  %vm878_vm0 = vmmov 0   ;;  %v879_v18 = vmov 0.0  }
  0x28   :  { %711 = vmatprep.subr.bf16.mxu1 %v876_v1  ;;  %54 = vperm.xlu0 %793, %v49_v2   ;;  %v688_v5 = vpack.c.bf16 %v80_v4, %v79_v3  ;;  %v691_v8 = vpack.c.bf16 %v82_v7, %v81_v6  ;;  %v83_v9 = vld [vmem:[#allocation2 + $0x20] sm:$0xff]  ;;  %v84_v10 = vld [vmem:[#allocation2 + $0x28] sm:$0xff]  ;;  %v85_v13 = vld [vmem:[#allocation2 + $0x30] sm:$0xff]  ;;  %s880_s6 = smov [#allocation7]  }
  0x29   :  { %v694_v12 = vpack.c.bf16 %v84_v10, %v83_v9  ;;  %v86_v14 = vld [vmem:[#allocation2 + $0x38] sm:$0xff]  ;;  %v87_v16 = vld [vmem:[#allocation2 + $0x40] sm:$0xff]  ;;  %v88_v17 = vld [vmem:[#allocation2 + $0x48] sm:$0xff]  ;;  %579 = vmatprep.mubr.msk.f32.mxu0 %vm878_vm0, %v879_v18  ;;  %614 = vmatprep.mubr.msk.f32.mxu1 %vm878_vm0, %v879_v18  ;;  %s461_s7 = sshll.u32 %s880_s6, 4  ;;  %s462_s7 = int_to_ptr.vmem [resolvable:$true] %s461_s7 }
  0x2a   :  { %689 = vmatpush3.bf16.msra.mxu0 %v688_v5  ;;  %v697_v15 = vpack.c.bf16 %v86_v14, %v85_v13  ;;  %v172_v19 = vld [vmem:[#allocation2 + $0x80] sm:$0xff]  ;;  %v173_v20 = vld [vmem:[#allocation2 + $0x88] sm:$0xff]  ;;  %v174_v21 = vld [vmem:[#allocation2 + $0x90] sm:$0xff]  ;;  %v700_v24 = vpack.c.bf16 %v88_v17, %v87_v16  ;;  %s843_s8 = scalar_lea.vmem %s462_s7, 128  ;;  %p848_p3 = scmp.lt.s32.totalorder %s462_s7, %s462_s7 }
  0x2b   :  { %690 = vmatprep.subr.bf16.mxu0 %v876_v1  ;;  %v712_v22 = vpack.c.bf16 %v173_v20, %v172_v19  ;;  %v175_v23 = vld [vmem:[#allocation2 + $0x98] sm:$0xff]  ;;  %v89_v25 = vld [vmem:[#allocation2 + $0x50] sm:$0xff]  ;;  %v176_v28 = vld [vmem:[#allocation2 + $0xa0] sm:$0xff]  ;;  %p844_p2 = scmp.ne.s32.totalorder %s462_s7, %s843_s8  ;;  %p849_p4 = scmp.lt.s32.totalorder %s843_s8, %s843_s8 }
  0x2c   :  { %794 = vset.pattern.permute.xlu0 %v877_v11  ;;  %v715_v26 = vpack.c.bf16 %v175_v23, %v174_v21  ;;  %v90_v27 = vld [vmem:[#allocation2 + $0x58] sm:$0xff]  ;;  %v177_v29 = vld [vmem:[#allocation2 + $0xa8] sm:$0xff]  ;;  %v91_v31 = vld [vmem:[#allocation2 + $0x60] sm:$0xff] }
  0x2d   :  { %69 = vperm.xlu0 %794, %v49_v2   ;;  %713 = vmatpush3.bf16.msra.mxu1 %v712_v22  ;;  %v703_v30 = vpack.c.bf16 %v90_v27, %v89_v25  ;;  %v718_v32 = vpack.c.bf16 %v177_v29, %v176_v28  ;;  %v92_v33 = vld [vmem:[#allocation2 + $0x68] sm:$0xff]  ;;  %v178_v34 = vld [vmem:[#allocation2 + $0xb0] sm:$0xff]  ;;  %v179_v35 = vld [vmem:[#allocation2 + $0xb8] sm:$0xff]  ;;  %p850_p5 = por %p849_p4, %p848_p3 }
  0x2e   :  { %692 = vmatpush3.bf16.msra.mxu0 %v691_v8  ;;  %714 = vmatprep.subr.bf16.mxu1 %v876_v1  ;;  %v706_v36 = vpack.c.bf16 %v92_v33, %v91_v31  ;;  %v93_v37 = vld [vmem:[#allocation2 + $0x70] sm:$0xff]  ;;  %v721_v38 = vpack.c.bf16 %v179_v35, %v178_v34  ;;  %v94_v39 = vld [vmem:[#allocation2 + $0x78] sm:$0xff]  ;;  %v180_v40 = vld [vmem:[#allocation2 + $0xc0] sm:$0xff] }
  0x2f   :  { %693 = vmatprep.subr.bf16.mxu0 %v876_v1  ;;  %v181_v41 = vld [vmem:[#allocation2 + $0xc8] sm:$0xff]  ;;  %v709_v42 = vpack.c.bf16 %v94_v39, %v93_v37  ;;  %v182_v44 = vld [vmem:[#allocation2 + $0xd0] sm:$0xff]  ;;  %v183_v45 = vld [vmem:[#allocation2 + $0xd8] sm:$0xff]  ;;  %p851_p6 = pnand %p850_p5, %p844_p2 }
  0x30   :  { %v724_v43 = vpack.c.bf16 %v181_v41, %v180_v40  ;;  %v727_v46 = vpack.c.bf16 %v183_v45, %v182_v44  ;;  %v184_v47 = vld [vmem:[#allocation2 + $0xe0] sm:$0xff]  ;;  %v185_v48 = vld [vmem:[#allocation2 + $0xe8] sm:$0xff]  ;;  %v471_v50 = vld [vmem:[%s1012_s1] ss:$0 sm:$0xff] }
  0x31   :  { %716 = vmatpush3.bf16.msra.mxu1 %v715_v26  ;;  %v730_v49 = vpack.c.bf16 %v185_v48, %v184_v47  ;;  %v472_v53 = vld [vmem:[%s1015_s4] ss:$0 sm:$0xff]  ;;  %v473_v54 = vld [vmem:[%s1012_s1 + $0x1] ss:$0 sm:$0xff]  ;;  %v186_v60 = vld [vmem:[#allocation2 + $0xf0] sm:$0xff] }
  0x32   :  { %695 = vmatpush3.bf16.msra.mxu0 %v694_v12  ;;  %717 = vmatprep.subr.bf16.mxu1 %v876_v1  ;;  %v187_v61 = vld [vmem:[#allocation2 + $0xf8] sm:$0xff]  ;;  %v265_v63 = vld [vmem:[#allocation2 + $0x100] sm:$0xff]  ;;  %v266_v0 = vld [vmem:[#allocation2 + $0x108] sm:$0xff] }
  0x33   :  { %696 = vmatprep.subr.bf16.mxu0 %v876_v1  ;;  %v733_v62 = vpack.c.bf16 %v187_v61, %v186_v60  ;;  %v267_v2 = vld [vmem:[#allocation2 + $0x110] sm:$0xff]  ;;  %v736_v3 = vpack.c.bf16 %v266_v0, %v265_v63  ;;  %v268_v4 = vld [vmem:[#allocation2 + $0x118] sm:$0xff]  ;;  %v269_v6 = vld [vmem:[#allocation2 + $0x120] sm:$0xff] }
  0x34   :  { %v739_v5 = vpack.c.bf16 %v268_v4, %v267_v2  ;;  %v270_v7 = vld [vmem:[#allocation2 + $0x128] sm:$0xff]  ;;  %v271_v9 = vld [vmem:[#allocation2 + $0x130] sm:$0xff]  ;;  %v272_v10 = vld [vmem:[#allocation2 + $0x138] sm:$0xff] }
  0x35   :  { %719 = vmatpush3.bf16.msra.mxu1 %v718_v32  ;;  %v742_v8 = vpack.c.bf16 %v270_v7, %v269_v6  ;;  %v745_v11 = vpack.c.bf16 %v272_v10, %v271_v9  ;;  %v273_v12 = vld [vmem:[#allocation2 + $0x140] sm:$0xff]  ;;  %v274_v13 = vld [vmem:[#allocation2 + $0x148] sm:$0xff]  ;;  %v276_v16 = vld [vmem:[#allocation2 + $0x158] sm:$0xff] }
  0x36   :  { %698 = vmatpush3.bf16.msra.mxu0 %v697_v15  ;;  %720 = vmatprep.subr.bf16.mxu1 %v876_v1  ;;  %v748_v14 = vpack.c.bf16 %v274_v13, %v273_v12  ;;  %v275_v15 = vld [vmem:[#allocation2 + $0x150] sm:$0xff]  ;;  %v277_v19 = vld [vmem:[#allocation2 + $0x160] sm:$0xff]  ;;  %v278_v20 = vld [vmem:[#allocation2 + $0x168] sm:$0xff] }
  0x37   :  { %699 = vmatprep.subr.bf16.mxu0 %v876_v1  ;;  %v751_v17 = vpack.c.bf16 %v276_v16, %v275_v15  ;;  %v754_v21 = vpack.c.bf16 %v278_v20, %v277_v19  ;;  %v474_v22 = vld [vmem:[%s1015_s4 + $0x1] ss:$0 sm:$0xff]  ;;  %v279_v27 = vld [vmem:[#allocation2 + $0x170] sm:$0xff]  ;;  %v358_v31 = vld [vmem:[#allocation5 + $0x8] sm:$0xff] }
  0x38   :  { %v280_v28 = vld [vmem:[#allocation2 + $0x178] sm:$0xff]  ;;  %v359_v32 = vld [vmem:[#allocation5 + $0x10] sm:$0xff]  ;;  %v362_v37 = vld [vmem:[#allocation5 + $0x28] sm:$0xff] }
  0x39   :  { %722 = vmatpush3.bf16.msra.mxu1 %v721_v38  ;;  %v757_v29 = vpack.c.bf16 %v280_v28, %v279_v27  ;;  %v360_v34 = vld [vmem:[#allocation5 + $0x18] sm:$0xff]  ;;  %v365_v41 = vld [vmem:[#allocation5 + $0x40] sm:$0xff]  ;;  %v367_v44 = vld [vmem:[#allocation5 + $0x50] sm:$0xff] }
  0x3a   :  { %701 = vmatpush3.bf16.msra.mxu0 %v700_v24  ;;  %723 = vmatprep.subr.bf16.mxu1 %v876_v1  ;;  %v763_v35 = vpack.c.bf16 %v360_v34, %v359_v32  ;;  %v364_v39 = vld [vmem:[#allocation5 + $0x38] sm:$0xff]  ;;  %v369_v47 = vld [vmem:[#allocation5 + $0x60] sm:$0xff]  ;;  %v370_v48 = vld [vmem:[#allocation5 + $0x68] sm:$0xff] }
  0x3b   :  { %702 = vmatprep.subr.bf16.mxu0 %v876_v1  ;;  %v368_v45 = vld [vmem:[#allocation5 + $0x58] sm:$0xff] }
  0x3d   :  { %725 = vmatpush3.bf16.msra.mxu1 %v724_v43 }
  0x3e   :  { %704 = vmatpush3.bf16.msra.mxu0 %v703_v30  ;;  %726 = vmatprep.subr.bf16.mxu1 %v876_v1  ;;  %v357_v30 = vld [vmem:[#allocation5] sm:$0xff] }
  0x3f   :  { %705 = vmatprep.subr.bf16.mxu0 %v876_v1  ;;  %v760_v33 = vpack.c.bf16 %v358_v31, %v357_v30 }
  0x41   :  { %728 = vmatpush3.bf16.msra.mxu1 %v727_v46  ;;  %v775_v46 = vpack.c.bf16 %v368_v45, %v367_v44 }
  0x42   :  { %707 = vmatpush3.bf16.msra.mxu0 %v706_v36  ;;  %729 = vmatprep.subr.bf16.mxu1 %v876_v1  ;;  %v361_v36 = vld [vmem:[#allocation5 + $0x20] sm:$0xff] }
  0x43   :  { %708 = vmatprep.subr.bf16.mxu0 %v876_v1  ;;  %v766_v38 = vpack.c.bf16 %v362_v37, %v361_v36 }
  0x45   :  { %731 = vmatpush3.bf16.msra.mxu1 %v730_v49  ;;  %v778_v49 = vpack.c.bf16 %v370_v48, %v369_v47 }
  0x46   :  { %710 = vmatpush3.bf16.msra.mxu0 %v709_v42  ;;  %732 = vmatprep.subr.bf16.mxu1 %v876_v1  ;;  %v366_v42 = vld [vmem:[#allocation5 + $0x48] sm:$0xff] }
  0x47   :  { %735 = vmatprep.subr.bf16.mxu0 %v876_v1  ;;  %v772_v43 = vpack.c.bf16 %v366_v42, %v365_v41 }
  0x49   :  { %734 = vmatpush3.bf16.msra.mxu1 %v733_v62  ;;  %v477_v62 = vld [vmem:[%s1015_s4 + $0x4] ss:$0 sm:$0xff] }
  0x4a   :  { %759 = vmatprep.subr.bf16.mxu1 %v876_v1 }
  0xa7   :  { %v55_v51 = vpop.permute.xlu0 %54 }
  0xa8   :  { %v61_v52 = vmul.f32 %v471_v50, %v55_v51  ;;  %v475_v50 = vld [vmem:[%s1015_s4 + $0x2] ss:$0 sm:$0xff] }
  0xaa   :  { %v66_v56 = vadd.f32 %v472_v53, %v61_v52 }
  0xac   :  { %v70_v55 = vpop.permute.xlu0 %69 }
  0xad   :  { %v76_v57 = vmul.f32 %v473_v54, %v70_v55  ;;  %v371_v55 = vld [vmem:[#allocation5 + $0x70] sm:$0xff] }
  0xaf   :  { %v77_v58 = vadd.f32 %v76_v57, %v66_v56  ;;  %v372_v56 = vld [vmem:[#allocation5 + $0x78] sm:$0xff] }
  0xb0   :  { %v781_v57 = vpack.c.bf16 %v372_v56, %v371_v55 }
  0xb1   :  { %v78_v59 = vmax.f32 %v77_v58, 0.0  ;;  %v476_v58 = vld [vmem:[%s1015_s4 + $0x3] ss:$0 sm:$0xff] }
  0xb3   :  { %580 = vmatmul.mubr.f32.vlgmr.msra.gmra.mrb[0].mxu0 %v78_v59 }
  0xb4   :  { %649 = vmatprep.mubr.msk.f32.mxu0 %vm878_vm0, %v879_v18  ;;  %737 = vmatpush3.bf16.msra.mxu0 %v736_v3 }
  0xb5   :  { %738 = vmatprep.subr.bf16.mxu0 %v876_v1 }
  0xb8   :  { %740 = vmatpush3.bf16.msra.mxu0 %v739_v5 }
  0xb9   :  { %741 = vmatprep.subr.bf16.mxu0 %v876_v1 }
  0xbc   :  { %743 = vmatpush3.bf16.msra.mxu0 %v742_v8 }
  0xbd   :  { %744 = vmatprep.subr.bf16.mxu0 %v876_v1 }
  0xc0   :  { %746 = vmatpush3.bf16.msra.mxu0 %v745_v11 }
  0xc1   :  { %747 = vmatprep.subr.bf16.mxu0 %v876_v1 }
  0xc4   :  { %749 = vmatpush3.bf16.msra.mxu0 %v748_v14 }
  0xc5   :  { %750 = vmatprep.subr.bf16.mxu0 %v876_v1 }
  0xc8   :  { %752 = vmatpush3.bf16.msra.mxu0 %v751_v17 }
  0xc9   :  { %753 = vmatprep.subr.bf16.mxu0 %v876_v1 }
  0xcc   :  { %755 = vmatpush3.bf16.msra.mxu0 %v754_v21 }
  0xcd   :  { %756 = vmatprep.subr.bf16.mxu0 %v876_v1 }
  0xd0   :  { %758 = vmatpush3.bf16.msra.mxu0 %v757_v29 }
 0x186   :  { %v166_v23 = vpop.f32.mrb[0].mxu0 }
 0x187   :  { %v167_v24 = vadd.f32 %v474_v22, %v166_v23  ;;  %v581_v25 = vpop.f32.mrb[1].mxu0 }
 0x189   :  { %v170_v26 = vmax.f32 %v167_v24, 0.0 }
 0x18b   :  { %615 = vmatmul.mubr.f32.vlgmr.msra.gmra.mrb[0].mxu1 %v170_v26 }
 0x18c   :  { %684 = vmatprep.mubr.msk.f32.mxu1 %vm878_vm0, %v879_v18  ;;  %761 = vmatpush3.bf16.msra.mxu1 %v760_v33  ;;  %v363_v18 = vld [vmem:[#allocation5 + $0x30] sm:$0xff] }
 0x18d   :  { %762 = vmatprep.subr.bf16.mxu1 %v876_v1  ;;  %v769_v40 = vpack.c.bf16 %v364_v39, %v363_v18 }
 0x190   :  { %764 = vmatpush3.bf16.msra.mxu1 %v763_v35 }
 0x191   :  { %765 = vmatprep.subr.bf16.mxu1 %v876_v1 }
 0x194   :  { %767 = vmatpush3.bf16.msra.mxu1 %v766_v38 }
 0x195   :  { %768 = vmatprep.subr.bf16.mxu1 %v876_v1 }
 0x198   :  { %770 = vmatpush3.bf16.msra.mxu1 %v769_v40 }
 0x199   :  { %771 = vmatprep.subr.bf16.mxu1 %v876_v1 }
 0x19c   :  { %773 = vmatpush3.bf16.msra.mxu1 %v772_v43 }
 0x19d   :  { %774 = vmatprep.subr.bf16.mxu1 %v876_v1 }
 0x1a0   :  { %776 = vmatpush3.bf16.msra.mxu1 %v775_v46 }
 0x1a1   :  { %777 = vmatprep.subr.bf16.mxu1 %v876_v1 }
 0x1a4   :  { %779 = vmatpush3.bf16.msra.mxu1 %v778_v49 }
 0x1a5   :  { %780 = vmatprep.subr.bf16.mxu1 %v876_v1 }
 0x1a8   :  { %782 = vmatpush3.bf16.msra.mxu1 %v781_v57 }
 0x25e   :  { %v259_v51 = vpop.f32.mrb[0].mxu1 }
 0x25f   :  { %v260_v52 = vadd.f32 %v475_v50, %v259_v51  ;;  %v616_v53 = vpop.f32.mrb[1].mxu1 }
 0x261   :  { %v263_v54 = vmax.f32 %v260_v52, 0.0 }
 0x263   :  { %650 = vmatmul.mubr.f32.vlgmr.msra.gmra.mrb[2].mxu0 %v263_v54 }
 0x336   :  { %v352_v59 = vpop.f32.mrb[2].mxu0 }
 0x337   :  { %v353_v60 = vadd.f32 %v476_v58, %v352_v59  ;;  %v651_v1 = vpop.f32.mrb[3].mxu0 }
 0x339   :  { %v356_v61 = vmax.f32 %v353_v60, 0.0 }
 0x33b   :  { %685 = vmatmul.mubr.f32.vlgmr.msra.gmra.mrb[2].mxu1 %v356_v61 }
 0x40e   :  { %v444_v63 = vpop.f32.mrb[2].mxu1 }
 0x40f   :  { %v445_v0 = vadd.f32 %v477_v62, %v444_v63  ;;  %v686_v2 = vpop.f32.mrb[3].mxu1 }
 0x411   :  { %v478_v3 = vmul.f32 -1.442695, %v445_v0 }
 0x413   :  { %795 = vpow2.f32 %v478_v3 }
 0x41d   :  { %v796_v4 = vpop.eup %795 }
 0x41e   :  { %v451_v5 = vadd.f32 1.0, %v796_v4 }
 0x420   :  { %797 = vrcp.f32 %v451_v5 }
 0x42a   :  { %v798_v6 = vpop.eup %797 }
 0x42b   :  { %454 = vst [vmem:[#allocation7] sm:$0xff] %v798_v6 }
 0x42c   :  { %854 = shalt.err (!%p851_p6)
}
 0x42d   :  { %s855_s10 = scalar_lea.hbm %s1016_s5, 128 }
 0x42e   :  { %p856_p7 = scmp.ne.s32.totalorder %s1016_s5, %s855_s10  ;;  %p859_p8 = scmp.lt.u32.totalorder %s855_s10, %s1016_s5 }
 0x430   :  { %p861_p9 = pnand %p859_p8, %p856_p7 }
 0x432   :  { %864 = shalt.err (!%p861_p9)
}
 0x433   :  { %464 = dma.vmem_to_hbm [thread:$0]  %s462_s7, 128, %s1016_s5, [#allocation4]  }
 0x434   :  { %869 = dma.done.wait [#allocation4], 128  }
 0x435   :  { %870 = vsyncadd [#allocation4], 4294967168 }
 0x436   :  { %468 = vsyncpa [#allocation3], 1 }
 0x437   :  { %469 = vsyncpa [#allocation6], 1 }
 0x438   :  { %470 = vsyncpa [#allocation4], 1 }

</bundles_post_ra>
